<compile_context>
chip_gen: v6e
topology: v6e:2x2x1
jax: 0.10.0
libtpu: 0.0.40
codegen_flags: <defaults>
</compile_context>

<pallas_src>
import functools

import jax
import jax.numpy as jnp
from jax.experimental import pallas as pl
from jax.experimental.pallas import tpu as pltpu


def _embeddings_kernel(p_ref, w_ref, posb_ref, o_ref, *, bb, n_patches):
    # p_ref:    (TM, K)   bf16 patch rows (TM = bb * n_patches)
    # w_ref:    (K, Hp)   bf16 flattened conv kernel (grid-invariant, resident)
    # posb_ref: (N, Hp)   f32  position embedding + conv bias (grid-invariant)
    # o_ref:    (TM, Hp)  output
    proj = jnp.dot(p_ref[...], w_ref[...],
                   preferred_element_type=jnp.float32)      # MXU, f32 accumulate
    pos = posb_ref[...]                                     # (N, Hp) f32
    for b in range(bb):                                     # static unroll, bb small
        row0 = b * n_patches
        o_ref[pl.ds(row0, n_patches), :] = (
            proj[row0:row0 + n_patches, :] + pos).astype(o_ref.dtype)


def _pick_bb(batch, n_patches, target_rows):
    """Rows per grid step = bb * n_patches.

    Hard constraints:  batch % bb == 0 (exact grid) and (bb*n_patches) % 8 == 0
    (sublane constraint of the row-tiled blocks).  Preferences: >= 2 grid steps
    (v7x megacore), TM % 128 == 0 (MXU row granule), largest TM <= target_rows
    (amortize ~0.35us per-step overhead).  Fallback: bb = batch (full-dim block
    is always legal)."""
    legal = [bb for bb in range(1, batch + 1)
             if batch % bb == 0 and (bb * n_patches) % 8 == 0]
    if not legal:
        return batch
    if batch >= 2:
        multi = [bb for bb in legal if batch // bb >= 2]
        legal = multi or legal
    fits = [bb for bb in legal if bb * n_patches <= target_rows] or [min(legal)]
    mxu = [bb for bb in fits if (bb * n_patches) % 128 == 0]
    return max(mxu) if mxu else max(fits)


def embeddings_forward(x, conv_w, conv_b, pos_emb, patch_size, *,
                       out_dtype=None, target_rows=512):
    """Eval-mode forward of `Embeddings`.

    x: (B, C, H, W) NCHW.  conv_w: (hidden, C, P, P).  conv_b: (hidden,).
    pos_emb: (1, N, hidden).  Returns (B, N, hidden) in out_dtype (default x.dtype).
    """
    B, C, H, W = x.shape
    P = patch_size
    hidden = conv_w.shape[0]
    nh, nw = H // P, W // P
    N = nh * nw
    K = C * P * P
    ROWS = B * N
    out_dtype = x.dtype if out_dtype is None else out_dtype

    # Lane-dense output slab: pad hidden up to a multiple of 128.
    Hp = ((hidden + 127) // 128) * 128

    # ---- glue: unfold NCHW into per-patch rows (K order = (C, dh, dw)), cast bf16.
    # transpose + convert is a single XLA fusion: one f32 read of x, one bf16
    # write of patches.  See TODO at top of file about moving this in-kernel.
    patches = (x.reshape(B, C, nh, P, nw, P)
                 .transpose(0, 2, 4, 1, 3, 5)
                 .reshape(ROWS, K)
                 .astype(jnp.bfloat16))

    # Tiny parameter prep (in a real pipeline done once at param-prep time):
    # flatten/transpose the conv kernel, fold the conv bias into the position
    # embedding, pad the lane (hidden) dim to Hp with zeros.
    w_mat = conv_w.reshape(hidden, K).T.astype(jnp.bfloat16)            # (K, hidden)
    posb = (pos_emb.reshape(N, hidden).astype(jnp.float32)
            + conv_b.astype(jnp.float32)[None, :])                      # (N, hidden)
    if Hp != hidden:
        w_mat = jnp.pad(w_mat, ((0, 0), (0, Hp - hidden)))
        posb = jnp.pad(posb, ((0, 0), (0, Hp - hidden)))

    # ---- row tiling: TM = bb * N rows per grid step ----
    bb = _pick_bb(B, N, target_rows)
    TM = bb * N
    grid = (ROWS // TM,)

    # Explicit VMEM budget: double-buffered streamed patches + output, resident
    # weight and posb (counted x2 to stay conservative).  Raise target_rows on
    # v6e (128 MiB physical VMEM) only together with this limit.
    out_bytes = jnp.dtype(out_dtype).itemsize
    est = (2 * TM * K * 2            # patches, bf16, double-buffered
           + 2 * K * Hp * 2          # weight, bf16, resident
           + 2 * N * Hp * 4          # posb, f32, resident
           + 2 * TM * Hp * out_bytes)  # output, double-buffered
    vmem_limit = int(min(48 * 2**20, max(32 * 2**20, 2 * est)))

    kernel = functools.partial(_embeddings_kernel, bb=bb, n_patches=N)

    out = pl.pallas_call(
        kernel,
        out_shape=jax.ShapeDtypeStruct((ROWS, Hp), out_dtype),
        grid_spec=pltpu.PrefetchScalarGridSpec(
            num_scalar_prefetch=0,
            grid=grid,
            in_specs=[
                # streamed patch rows; add pipeline_mode=pl.Buffered(3) here on
                # v5e only if xprof shows exposed DMA.
                pl.BlockSpec((TM, K), lambda i: (i, 0)),
                pl.BlockSpec((K, Hp), lambda i: (0, 0)),     # resident weight
                pl.BlockSpec((N, Hp), lambda i: (0, 0)),     # resident pos+bias
            ],
            out_specs=pl.BlockSpec((TM, Hp), lambda i: (i, 0)),
        ),
        compiler_params=pltpu.CompilerParams(
            dimension_semantics=("parallel",),
            vmem_limit_bytes=vmem_limit),
    )(patches, w_mat, posb)

    # Dropout is identity in eval mode.
    if Hp != hidden:
        out = out[:, :hidden]
    return out.reshape(B, N, hidden)


if __name__ == "__main__":
    # Small config consistent with the module:
    #   img_size=16, patch_size=4 -> n_patches=16, in_channels=4, hidden=32
    B, C, HW, P, HID = 2, 4, 16, 4, 32
    N = (HW // P) * (HW // P)
    K = C * P * P

    key = jax.random.PRNGKey(0)
    kx, kw, kb, kp = jax.random.split(key, 4)
    x = jax.random.normal(kx, (B, C, HW, HW), dtype=jnp.float32)
    conv_w = jax.random.normal(kw, (HID, C, P, P), dtype=jnp.float32) * 0.05
    conv_b = jax.random.normal(kb, (HID,), dtype=jnp.float32) * 0.05
    pos_emb = jax.random.normal(kp, (1, N, HID), dtype=jnp.float32) * 0.02

    out = jax.block_until_ready(embeddings_forward(x, conv_w, conv_b, pos_emb, P))

    # pure-JAX references (same unfold + einsum)
    patches_ref = x.reshape(B, C, HW // P, P, HW // P, P)
    patches_ref = patches_ref.transpose(0, 2, 4, 1, 3, 5).reshape(B, N, K)
    w_flat = conv_w.reshape(HID, K)

    # reference with the same bf16 operand cast (tight check of kernel math)
    ref_bf16 = jnp.einsum("bnk,kh->bnh",
                          patches_ref.astype(jnp.bfloat16),
                          w_flat.T.astype(jnp.bfloat16),
                          preferred_element_type=jnp.float32)
    ref_bf16 = ref_bf16 + conv_b[None, None, :] + pos_emb

    # full-precision reference (loose check vs. the f32 module semantics)
    ref_f32 = jnp.einsum("bnk,hk->bnh", patches_ref, w_flat)
    ref_f32 = ref_f32 + conv_b[None, None, :] + pos_emb

    assert out.shape == (B, N, HID)
    assert out.dtype == x.dtype
    assert jnp.allclose(out, ref_bf16, atol=1e-3, rtol=1e-3)
    assert jnp.allclose(out, ref_f32, atol=3e-2, rtol=3e-2)

    # optional bf16-output path (halves HBM writeback when downstream is bf16)
    out_bf16 = jax.block_until_ready(
        embeddings_forward(x, conv_w, conv_b, pos_emb, P, out_dtype=jnp.bfloat16))
    assert out_bf16.dtype == jnp.bfloat16
    assert jnp.allclose(out_bf16.astype(jnp.float32), ref_bf16, atol=2e-2, rtol=2e-2)

    print("KERNEL_OK")
</pallas_src>

<mosaic_0001>
module attributes {stable_mosaic.version = 11 : i64} {
  func.func @_embeddings_kernel(%arg0: i32, %arg1: memref<16x64xbf16, #tpu.memory_space<vmem>>, %arg2: memref<64x128xbf16, #tpu.memory_space<vmem>>, %arg3: memref<16x128xf32, #tpu.memory_space<vmem>>, %arg4: memref<16x128xf32, #tpu.memory_space<vmem>>) attributes {dimension_semantics = [#tpu.dimension_semantics<parallel>], iteration_bounds = array<i64: 2>, scalar_prefetch = 0 : i64, scratch_operands = 0 : i64, tpu.core_type = #tpu.core_type<tc>, window_params = [{transform_indices = @transform_0, window_bounds = array<i64: 16, 64>}, {pipeline_mode = #tpu.pipeline_mode<synchronous>, transform_indices = @transform_1, window_bounds = array<i64: 64, 128>}, {pipeline_mode = #tpu.pipeline_mode<synchronous>, transform_indices = @transform_2, window_bounds = array<i64: 16, 128>}, {transform_indices = @transform_3, window_bounds = array<i64: 16, 128>}]} {
    %c0 = arith.constant 0 : index
    %c0_0 = arith.constant 0 : index
    %0 = vector.load %arg1[%c0, %c0_0] : memref<16x64xbf16, #tpu.memory_space<vmem>>, vector<16x64xbf16>
    %c0_1 = arith.constant 0 : index
    %c0_2 = arith.constant 0 : index
    %1 = vector.load %arg2[%c0_1, %c0_2] : memref<64x128xbf16, #tpu.memory_space<vmem>>, vector<64x128xbf16>
    %cst = arith.constant dense<0.000000e+00> : vector<16x128xf32>
    %2 = tpu.matmul %0, %1, %cst {dimension_numbers = #tpu.dot_dimension_numbers<[1], [0], [0], [1], [0, 0, 1, 1], [], []>} : vector<16x64xbf16>, vector<64x128xbf16>, vector<16x128xf32> -> vector<16x128xf32>
    %c0_3 = arith.constant 0 : index
    %c0_4 = arith.constant 0 : index
    %3 = vector.load %arg3[%c0_3, %c0_4] : memref<16x128xf32, #tpu.memory_space<vmem>>, vector<16x128xf32>
    %4 = arith.addf %2, %3 : vector<16x128xf32>
    %c0_5 = arith.constant 0 : index
    %c0_6 = arith.constant 0 : index
    %5 = vector.load %arg4[%c0_5, %c0_6] : memref<16x128xf32, #tpu.memory_space<vmem>>, vector<16x128xf32>
    tpu.vector_store %arg4[%c0_5, %c0_6], %4 {strides = array<i32>} : memref<16x128xf32, #tpu.memory_space<vmem>>, vector<16x128xf32>,
    return
  }
  func.func @transform_0(%arg0: i32) -> (i32, i32) {
    %c0_i32 = arith.constant 0 : i32
    %c0_i32_0 = arith.constant 0 : i32
    return %arg0, %c0_i32 : i32, i32
  }
  func.func @transform_1(%arg0: i32) -> (i32, i32) {
    %c0_i32 = arith.constant 0 : i32
    %c0_i32_0 = arith.constant 0 : i32
    %c0_i32_1 = arith.constant 0 : i32
    return %c0_i32, %c0_i32_0 : i32, i32
  }
  func.func @transform_2(%arg0: i32) -> (i32, i32) {
    %c0_i32 = arith.constant 0 : i32
    %c0_i32_0 = arith.constant 0 : i32
    %c0_i32_1 = arith.constant 0 : i32
    return %c0_i32, %c0_i32_0 : i32, i32
  }
  func.func @transform_3(%arg0: i32) -> (i32, i32) {
    %c0_i32 = arith.constant 0 : i32
    %c0_i32_0 = arith.constant 0 : i32
    return %arg0, %c0_i32 : i32, i32
  }
}

</mosaic_0001>

<bundles_post_ra>
// kernel: tpu_custom_call.1
= control target key start
LH: loop header
LB: loop body
LE: loop exit
PB: predicated region body
PF: predicated region fallthrough
CT: control target
= control target key end

     0   :  { %8 = vsyncpa [#allocation3], 0  ;;  %s915_s0 = inlined_call_operand.hbm [shape: bf16[32,64], index: 0, kind: input, shape index: {}]   ;;  %s916_s1 = inlined_call_operand.hbm [shape: bf16[64,128], index: 1, kind: input, shape index: {}]   ;;  %s917_s2 = inlined_call_operand.hbm [shape: f32[16,128], index: 2, kind: input, shape index: {}]   ;;  %s918_s3 = inlined_call_operand.hbm [shape: f32[32,128], index: 3, kind: output, shape index: {}]  }
   0x1   :  { %10 = vsyncpa [#allocation3 + $0x1], 0 }
   0x2   :  { %11 = vsyncpa [#allocation6], 0 }
   0x3   :  { %12 = vsyncpa [#allocation4], 0 }
   0x4   :  { %14 = vsyncpa [#allocation4 + $0x1], 0  ;;  %s720_s12 = smov 0   ;;  %s722_s13 = smov 0  }
   0x5   :  { %s724_s14 = smov 0   ;;  %s726_s15 = smov 0  }
   0x6 LB: > { %s741_s16 = sadd.s32 4294967295, %s686_s15   ;;  %s415_s17 = sadd.s32 4294967294, %s686_s15   ;;  %s686_s15 = sphi %s726_s15, %s939_s15   ;;  %s682_s14 = sphi %s724_s14, %s938_s14   ;;  %s678_s13 = sphi %s722_s13, %s937_s13   ;;  %s674_s12 = sphi %s720_s12, %s936_s12  }
   0x7   : > { %p40_p0 = scmp.ne.s32.totalorder %s678_s13, %s674_s12  ;;  %p919_p1 = scmp.eq.s32.totalorder %s741_s16, 0 }
   0x8   : > { %p106_p2 = scmp.eq.s32.totalorder %s741_s16, 1  ;;  %p112_p3 = scmp.eq.s32.totalorder %s415_s17, 1 }
   0x9   : > { %p750_p4 = por %p919_p1, %p40_p0  ;;  %p416_p5 = scmp.ge.s32.totalorder %s686_s15, 1 }
   0xa   : > { %p755_p6 = por %p112_p3, %p40_p0  ;;  %p119_p7 = scmp.lt.s32.totalorder %s686_s15, 3 }
   0xb   : > { %s923_s18 = scalar_select %p750_p4, 1, 0 }
   0xc   : > { %s924_s19 = scalar_select %p755_p6, 1, 0 }
   0xd   : > { %p760_p8 = pnand %p416_p5, %p119_p7  ;;  %s688_s21 = smov [#allocation5]  }
   0xe   : > { %s131_s22 = sshll.u32 %s688_s21, 4  ;;  %s689_s24 = smov [#allocation7]   ;;  %s132_s22 = int_to_ptr.vmem [resolvable:$true] %s131_s22 }
   0xf   : > { %s925_s20 = scalar_select %p760_p8, 1, 0 }
  0x10   : > { %p470_p9 = pneg %p760_p8  ;;  %s144_s25 = sshll.u32 %s689_s24, 4  ;;  %s145_s25 = int_to_ptr.vmem [resolvable:$true] %s144_s25 }
  0x11   : > { %s549_s26 = scalar_lea.vmem %s132_s22, 512  ;;  %p557_p5 = scmp.lt.s32.totalorder %s132_s22, %s132_s22 }
  0x12   : > { %p769_p11 = pnand %p470_p9, %p919_p1  ;;  %p550_p13 = scmp.ne.s32.totalorder %s132_s22, %s549_s26 }
  0x13   : > { %p558_p7 = scmp.lt.s32.totalorder %s549_s26, %s549_s26 }
  0x14   : > { %p540_p12 = pneg %p769_p11 }
  0x15   : > { %p559_p10 = por %p558_p7, %p557_p5 }
  0x16   : > { %p552_p0 = pnand %p550_p13, %p540_p12 }
  0x18   : > { %p553_p3 = pneg %p552_p0 }
  0x1a   : > { %p560_p9 = pnand %p559_p10, %p553_p3 }
  0x1c   : > { %563 = shalt.err (!%p560_p9)
}
  0x1d   : > { %s690_s27 = smov 64   ;;  %s691_s28 = smov 4  }
  0x1e   : > { %473 = dma.hbm_to_vmem [thread:$0]  (!%p769_p11), %s916_s1, 512, %s132_s22, [#allocation6], %s690_s27, %s690_s27, %s691_s28  }
  0x1f   : > { %s575_s4 = scalar_lea.vmem %s145_s25, 256  ;;  %p583_p10 = scmp.lt.s32.totalorder %s145_s25, %s145_s25 }
  0x20   : > { %p576_p13 = scmp.ne.s32.totalorder %s145_s25, %s575_s4  ;;  %p584_p3 = scmp.lt.s32.totalorder %s575_s4, %s575_s4 }
  0x22   : > { %p578_p0 = pnand %p576_p13, %p540_p12  ;;  %p585_p7 = por %p584_p3, %p583_p10 }
  0x24   : > { %p579_p5 = pneg %p578_p0 }
  0x26   : > { %p586_p9 = pnand %p585_p7, %p579_p5 }
  0x28   : > { %589 = shalt.err (!%p586_p9)
}
  0x29   : > { %s692_s5 = smov 128   ;;  %s693_s6 = smov 8  }
  0x2a   : > { %476 = dma.hbm_to_vmem [thread:$0]  (!%p769_p11), %s917_s2, 256, %s145_s25, [#allocation6], %s692_s5, %s692_s5, %s693_s6  }
  0x2b   : > { %s795_s9 = sadd.s32 1, %s686_s15   ;;  %s27_s11 = sadd.s32 1, %s682_s14 }
  0x2c   : > { %s24_s10 = ssub.s32 %s686_s15, %s795_s9  ;;  %p34_p13 = scmp.ne.s32.totalorder %s682_s14, %s678_s13 }
  0x2d   : > { %p25_p12 = scmp.eq.s32.totalorder %s24_s10, 0  ;;  %p35_p0 = scmp.eq.s32.totalorder %s686_s15, 0 }
  0x2e   : > { %p808_p10 = por %p106_p2, %p34_p13  ;;  %p487_p3 = scmp.lt.s32.totalorder %s686_s15, 2 }
  0x2f   : > { %s804_s17 = scalar_select %p25_p12, %s682_s14, %s27_s11  }
  0x30   : > { %p36_p5 = por %p35_p0, %p34_p13  ;;  %s158_s22 = sand.u32 1, %s682_s14  }
  0x31   : > { %s927_s21 = scalar_select %p808_p10, 1, 0 }
  0x32   : > { %s420_s23 = sshll.u32 %s158_s22, 3  ;;  %s439_s24 = sshll.u32 %s686_s15, 7 }
  0x33   : > { %s818_s29 = scalar_lea.hbm %s915_s0, %s439_s24  ;;  %s162_s30 = scalar_lea.vmem [#allocation2], %s420_s23 }
  0x34   : > { %s169_s4 = sshll.u32 %s162_s30, 4  ;;  %p822_p2 = pnand %p487_p3, %p36_p5  ;;  %s820_s4 = int_to_ptr.vmem [resolvable:$true] %s169_s4 }
  0x35   : > { %s826_s6 = scalar_lea.sflag [#allocation3], %s158_s22  ;;  %s590_s7 = scalar_lea.hbm %s818_s29, 128 }
  0x36   : > { %p591_p11 = scmp.ne.s32.totalorder %s818_s29, %s590_s7  ;;  %p592_p7 = pneg %p822_p2 }
  0x37   : > { %s595_s11 = scalar_lea.hbm %s915_s0, 256  ;;  %p596_p13 = scmp.lt.s32.totalorder %s818_s29, %s915_s0 }
  0x38   : > { %p593_p9 = pnand %p592_p7, %p591_p11  ;;  %p597_p0 = scmp.lt.s32.totalorder %s595_s11, %s590_s7 }
  0x3a   : > { %p594_p12 = pneg %p593_p9  ;;  %p598_p5 = por %p597_p0, %p596_p13 }
  0x3c   : > { %p599_p3 = pnand %p598_p5, %p594_p12 }
  0x3e   : > { %602 = shalt.err (!%p599_p3)
}
  0x3f   : > { %s603_s22 = scalar_lea.vmem %s820_s4, 128  ;;  %s694_s25 = smov [#allocation2]  }
  0x40   : > { %p604_p1 = scmp.ne.s32.totalorder %s820_s4, %s603_s22  ;;  %s608_s26 = sshll.u32 %s694_s25, 4  ;;  %s609_s26 = int_to_ptr.vmem [resolvable:$false] %s608_s26 }
  0x41   : > { %s610_s30 = scalar_lea.vmem %s609_s26, 256  ;;  %p611_p9 = scmp.lt.s32.totalorder %s820_s4, %s609_s26 }
  0x42   : > { %p606_p6 = pnand %p604_p1, %p592_p7  ;;  %p612_p10 = scmp.lt.s32.totalorder %s610_s30, %s603_s22 }
  0x44   : > { %p607_p11 = pneg %p606_p6  ;;  %p613_p4 = por %p612_p10, %p611_p9 }
  0x46   : > { %p614_p8 = pnand %p613_p4, %p607_p11 }
  0x48   : > { %617 = shalt.err (!%p614_p8)
}
  0x49   : > { %480 = dma.hbm_to_vmem [thread:$0]  (!%p822_p2), %s818_s29, 128, %s820_s4, %s826_s6, %s690_s27, %s690_s27, %s691_s28  }
  0x4a   : > { %p929_p1 = scmp.ne.s32.totalorder %s925_s20, 0 }
  0x4b   : > { %s853_s7 = sand.u32 (!%p929_p1), 1, %s678_s13   ;;  %p930_p4 = scmp.ne.s32.totalorder (!%p929_p1), %s923_s18, 0 }
  0x4c   : > { %181 = sbr.rel (%p929_p1) target bundleno = 315 (0x13b), region = 32  ;;  %s424_s8 = sshll.u32 (!%p929_p1), %s853_s7, 3 }
  0x4d   : > { %s184_s10 = scalar_lea.sflag (!%p929_p1), [#allocation3], %s853_s7  ;;  %s187_s11 = scalar_lea.vmem (!%p929_p1), [#allocation2], %s424_s8 }
  0x51   : > { %661 = dma.done.wait (%p930_p4), %s184_s10, 128  }
  0x52   : > { %663 = vsyncadd (%p930_p4), %s184_s10, 4294967168  ;;  %p931_p6 = scmp.eq.s32.totalorder %s741_s16, 0 }
  0x54   : > { %665 = dma.done.wait (%p931_p6), [#allocation6], 768   ;;  %p932_p8 = pmov %p931_p6 }
  0x55   : > { %v695_v0 = vmov 0.0   ;;  %vm696_vm0 = vmmov 0   ;;  %v533_v1 = vld [vmem:[#allocation5 + $0x18] sm:$0xff]   ;;  %v534_v2 = vld [vmem:[#allocation5 + $0x10] sm:$0xff]   ;;  %v535_v3 = vld [vmem:[#allocation5 + $0x8] sm:$0xff]   ;;  %vm262_vm1 = vcmask 523264  }
  0x56   : > { %667 = vsyncadd (%p932_p8), [#allocation6], 4294966528  ;;  %446 = vmatprep.subr.bf16.mxu0 %v695_v0  ;;  %454 = vmatprep.mubr.msk.bf16.mxu0 %vm696_vm0, %v695_v0  ;;  %v536_v4 = vld [vmem:[#allocation5] sm:$0xff]   ;;  %v537_v5 = vld [vmem:[%s187_s11] sm:$0xff]   ;;  %s427_s18 = sshll.u32 %s853_s7, 4  ;;  %s440_s28 = sshll.u32 %s741_s16, 8 }
  0x57   : > { %447 = vmatpush3.bf16.msra.mxu0 %v533_v1  ;;  %v231_v6 = vld [vmem:[#allocation7] sm:$0xff]  ;;  %s217_s20 = scalar_lea.vmem [#allocation8], %s427_s18  ;;  %v232_v10 = vld [vmem:[#allocation7 + $0x8] sm:$0xff]  ;;  %s872_s5 = scalar_lea.hbm %s918_s3, %s440_s28 }
  0x58   : > { %448 = vmatprep.subr.bf16.mxu0 %v695_v0  ;;  %s323_s27 = sshll.u32 %s217_s20, 4  ;;  %s310_s6 = scalar_lea.sflag [#allocation4], %s853_s7  ;;  %s867_s27 = int_to_ptr.vmem [resolvable:$true] %s323_s27 }
  0x59   : > { %s618_s23 = scalar_lea.vmem %s867_s27, 256  ;;  %p933_p2 = scmp.ne.s32.totalorder %s927_s21, 0 }
  0x5a   : > { %p619_p10 = scmp.ne.s32.totalorder %s867_s27, %s618_s23  ;;  %s697_s16 = smov [#allocation8]  }
  0x5b   : > { %449 = vmatpush3.bf16.msra.mxu0 %v534_v2  ;;  %s622_s24 = sshll.u32 %s697_s16, 4  ;;  %s623_s24 = int_to_ptr.vmem [resolvable:$false] %s622_s24 }
  0x5c   : > { %450 = vmatprep.subr.bf16.mxu0 %v695_v0  ;;  %p620_p7 = pnand %p619_p10, %p933_p2  ;;  %s624_s22 = scalar_lea.vmem %s623_s24, 512 }
  0x5d   : > { %p625_p13 = scmp.lt.s32.totalorder %s867_s27, %s623_s24  ;;  %p626_p0 = scmp.lt.s32.totalorder %s624_s22, %s618_s23 }
  0x5e   : > { %p621_p12 = pneg %p620_p7 }
  0x5f   : > { %451 = vmatpush3.bf16.msra.mxu0 %v535_v3  ;;  %p627_p5 = por %p626_p0, %p625_p13 }
  0x60   : > { %452 = vmatprep.subr.bf16.mxu0 %v695_v0 }
  0x61   : > { %p628_p3 = pnand %p627_p5, %p621_p12 }
  0x63   : > { %453 = vmatpush3.bf16.msra.mxu0 %v536_v4 }
  0x66   : > { %455 = vmatmul.mubr.msk.bf16.vlgmr.msra.gmra.mxu0 %vm262_vm1, %v537_v5 }
 0x126   : > { %v300_v7 = vpop.f32.mrf.mxu0 }
 0x127   : > { %v301_v8 = vadd.f32 %v300_v7, %v231_v6 }
 0x128   : > { %v456_v9 = vpop.f32.mrf.mxu0 }
 0x129   : > { %307 = vst [vmem:[%s217_s20] sm:$0xff] %v301_v8 }
 0x12a   : > { %v303_v11 = vpop.f32.mrf.mxu0 }
 0x12b   : > { %v304_v12 = vadd.f32 %v303_v11, %v232_v10 }
 0x12c   : > { %v457_v13 = vpop.f32.mrf.mxu0 }
 0x12d   : > { %308 = vst [vmem:[%s217_s20 + $0x8] sm:$0xff] %v304_v12 }
 0x12e   : > { %631 = shalt.err (!%p628_p3)
}
 0x12f   : > { %s632_s25 = scalar_lea.hbm %s872_s5, 256  ;;  %s636_s8 = scalar_lea.hbm %s918_s3, 512 }
 0x130   : > { %p633_p11 = scmp.ne.s32.totalorder %s872_s5, %s632_s25  ;;  %p637_p4 = scmp.lt.s32.totalorder %s872_s5, %s918_s3 }
 0x131   : > { %p638_p6 = scmp.lt.s32.totalorder %s636_s8, %s632_s25 }
 0x132   : > { %p634_p9 = pnand %p633_p11, %p933_p2 }
 0x133   : > { %p639_p8 = por %p638_p6, %p637_p4 }
 0x134   : > { %p635_p1 = pneg %p634_p9 }
 0x136   : > { %p640_p10 = pnand %p639_p8, %p635_p1 }
 0x138   : > { %643 = shalt.err (!%p640_p10)
}
 0x139   : > { %s698_s18 = smov 128   ;;  %s699_s20 = smov 8  }
 0x13a   : > { %468 = dma.vmem_to_hbm [thread:$0]  (%p933_p2), %s867_s27, 256, %s872_s5, %s310_s6, %s698_s18, %s698_s18, %s699_s20  }
 0x13b PF: > { %s338_s28 = sand.u32 1, %s674_s12   ;;  %p934_p7 = scmp.ne.s32.totalorder %s924_s19, 0 }
 0x13c   : > { %p935_p12 = scmp.ge.s32.totalorder %s686_s15, 2  ;;  %s339_s29 = scalar_lea.sflag [#allocation4], %s338_s28 }
 0x13e   : > { %p482_p13 = pnand %p935_p12, %p934_p7 }
 0x140   : > { %p483_p0 = pneg %p482_p13 }
 0x142   : > { %669 = dma.done.wait (%p483_p0), %s339_s29, 256  }
 0x143   : > { %671 = vsyncadd (%p483_p0), %s339_s29, 4294967040  ;;  %p17_p5 = scmp.ge.s32.totalorder %s795_s9, 4   ;;  %s936_s12 = smov %s678_s13 }
 0x144   : > { %s937_s13 = smov %s682_s14  ;;  %s938_s14 = smov %s804_s17 }
 0x145   : > { %s939_s15 = smov %s795_s9  ;;  %19 = sbr.rel (!%p17_p5) target bundleno = 6 (0x6), region = 85 }
 0x14a   :  { %344 = vsyncpa [#allocation3], 1 }
 0x14b   :  { %346 = vsyncpa [#allocation3 + $0x1], 1 }
 0x14c   :  { %347 = vsyncpa [#allocation6], 1 }
 0x14d   :  { %348 = vsyncpa [#allocation4], 1 }
 0x14e   :  { %350 = vsyncpa [#allocation4 + $0x1], 1 }

</bundles_post_ra>
